<compile_context>
chip_gen: v7x
topology: tpu7x:2x2x1
jax: 0.10.0
libtpu: 0.0.40
codegen_flags: <defaults>
</compile_context>

<pallas_src>
import functools

import jax
import jax.numpy as jnp
from jax.experimental import pallas as pl
from jax.experimental.pallas import tpu as pltpu

LEAK_VALUE = 0.1   # LeakyReLU negative slope (module-level constant in the repo)
BN_EPS = 1e-5
LN_EPS = 1e-5


# --------------------------------------------------------------------------
# Kernel
# --------------------------------------------------------------------------
def _predictor_kernel(num_layers, dims, batch, x_ref, *refs):
    """refs = (W_0, ..., W_{L-1}, affine_slab, out).

    dims = (latent, f_1, ..., f_L) — static Python ints.
    affine_slab rows: [bn_g, bn_b, ln_g, ln_b] * L, then w_final row, then
    a row whose element 0 is b_final. Lane dim padded to a multiple of 128.
    """
    w_refs = refs[:num_layers]
    aff_ref = refs[num_layers]
    o_ref = refs[num_layers + 1]

    h = x_ref[...].astype(jnp.float32)

    for li in range(num_layers):
        out_f = dims[li + 1]
        row = 4 * li

        # ---- Linear, bias=False (weight pre-transposed to (in_f, out_f)) ----
        h = jnp.dot(h, w_refs[li][...], preferred_element_type=jnp.float32)

        bn_g = aff_ref[row + 0:row + 1, :out_f]   # (1, out_f)
        bn_b = aff_ref[row + 1:row + 2, :out_f]
        ln_g = aff_ref[row + 2:row + 3, :out_f]
        ln_b = aff_ref[row + 3:row + 4, :out_f]

        # ---- BatchNorm1d (training mode: batch stats over dim 0, biased var) ----
        inv_b = 1.0 / batch
        mu = jnp.sum(h, axis=0, keepdims=True) * inv_b            # (1, out_f)
        ms = jnp.sum(h * h, axis=0, keepdims=True) * inv_b        # (1, out_f)
        var = ms - mu * mu
        scale = bn_g * jax.lax.rsqrt(var + BN_EPS)                # (1, out_f)
        shift = bn_b - mu * scale                                 # (1, out_f)
        h = h * scale + shift                                     # 2 full-tensor passes

        # ---- LayerNorm over last (feature) dim, biased variance ----
        inv_f = 1.0 / out_f
        lmu = jnp.sum(h, axis=-1, keepdims=True) * inv_f          # (B, 1)
        lms = jnp.sum(h * h, axis=-1, keepdims=True) * inv_f      # (B, 1)
        lvar = lms - lmu * lmu
        linv = jax.lax.rsqrt(lvar + LN_EPS)                       # (B, 1), EUP
        h = (h - lmu) * linv
        h = h * ln_g + ln_b

        # ---- LeakyReLU (0 < slope < 1  =>  max(h, slope*h)) ----
        h = jnp.maximum(h, LEAK_VALUE * h)

    # ---- Final Linear (out_features=1): VPU mul + lane reduce, no MXU ----
    last_f = dims[-1]
    frow = 4 * num_layers
    wf = aff_ref[frow:frow + 1, :last_f]                          # (1, last_f)
    bf = aff_ref[frow + 1:frow + 2, 0:1]                          # (1, 1)
    out = jnp.sum(h * wf, axis=-1, keepdims=True) + bf            # (B, 1)
    o_ref[...] = out.astype(o_ref.dtype)


# --------------------------------------------------------------------------
# Parameter packing (done ONCE, outside the per-call hot path)
# --------------------------------------------------------------------------
def pack_params(params, latent_size):
    """Pre-transpose weights and pack all small vectors into one f32 slab."""
    layers = params["layers"]
    num_layers = len(layers)
    out_feats = [lyr["w"].shape[0] for lyr in layers]
    dims = (latent_size,) + tuple(out_feats)

    # Lane dim of the slab: padded to a multiple of 128 (lane-dense layout).
    f_pad = max(128, ((max(out_feats) + 127) // 128) * 128)
    n_rows = 4 * num_layers + 2

    weights = []
    rows = []
    for lyr in layers:
        out_f = lyr["w"].shape[0]
        weights.append(jnp.transpose(lyr["w"]).astype(jnp.float32))  # (in_f, out_f)
        for name in ("bn_gamma", "bn_beta", "ln_gamma", "ln_beta"):
            v = lyr[name].astype(jnp.float32)
            rows.append(jnp.pad(v, (0, f_pad - out_f)))

    # Final linear: weight (1, in_f) -> one row; bias -> element 0 of last row.
    wf = params["w_final"].reshape(-1).astype(jnp.float32)
    rows.append(jnp.pad(wf, (0, f_pad - wf.shape[0])))
    bf = params["b_final"].reshape(-1).astype(jnp.float32)
    rows.append(jnp.pad(bf, (0, f_pad - bf.shape[0])))

    affine = jnp.stack(rows, axis=0)                                 # (n_rows, f_pad)
    assert affine.shape == (n_rows, f_pad)

    return dict(
        weights=tuple(weights),
        affine=affine,
        dims=dims,
        num_layers=num_layers,
    )


# --------------------------------------------------------------------------
# Forward wrapper
# --------------------------------------------------------------------------
def property_predictor_forward(x, packed):
    """Pallas-backed forward. x: (B, latent_size) -> (B,) f32 (0-d if B == 1)."""
    B = x.shape[0]
    num_layers = packed["num_layers"]
    dims = packed["dims"]

    # Whole-batch resident design: guard the VMEM footprint (worst case v7x, 64 MiB).
    max_f = max(dims)
    est_bytes = 4 * (x.size
                     + sum(int(w.size) for w in packed["weights"])
                     + int(packed["affine"].size)
                     + 6 * B * max_f        # a few live activation copies
                     + B)
    if est_bytes > 30 * 1024 * 1024:
        # TODO(synk): add batch tiling (grid over B) with cross-tile BN-stat exchange.
        raise ValueError(f"batch too large for whole-batch VMEM residency "
                         f"(~{est_bytes >> 20} MiB estimated)")

    args = [x.astype(jnp.float32)] + list(packed["weights"]) + [packed["affine"]]
    kernel = functools.partial(_predictor_kernel, num_layers, dims, B)

    out = pl.pallas_call(
        kernel,
        out_shape=jax.ShapeDtypeStruct((B, 1), jnp.float32),
        in_specs=[pl.BlockSpec(memory_space=pltpu.MemorySpace.VMEM)
                  for _ in args],
        out_specs=pl.BlockSpec(memory_space=pltpu.MemorySpace.VMEM),
        compiler_params=pltpu.CompilerParams(vmem_limit_bytes=32 * 1024 * 1024),
    )(*args)

    # Matches torch .squeeze(): (B,1) -> (B,); (1,1) -> scalar.
    return jnp.squeeze(out)


# --------------------------------------------------------------------------
# Parameter init + pure-JAX reference
# --------------------------------------------------------------------------
def init_params(key, latent_size, prop_pred_filters):
    """Deterministic parameter init mimicking PyTorch defaults (shapes only matter)."""
    dims = [latent_size] + list(prop_pred_filters)
    layers = []
    for in_f, out_f in zip(dims[:-1], dims[1:]):
        key, wk = jax.random.split(key)
        bound = 1.0 / float(in_f) ** 0.5
        w = jax.random.uniform(wk, (out_f, in_f), jnp.float32, -bound, bound)
        layers.append(dict(
            w=w,
            bn_gamma=jnp.ones((out_f,), jnp.float32),
            bn_beta=jnp.zeros((out_f,), jnp.float32),
            ln_gamma=jnp.ones((out_f,), jnp.float32),
            ln_beta=jnp.zeros((out_f,), jnp.float32),
        ))
    key, wk, bk = jax.random.split(key, 3)
    in_f = dims[-1]
    bound = 1.0 / float(in_f) ** 0.5
    w_final = jax.random.uniform(wk, (1, in_f), jnp.float32, -bound, bound)
    b_final = jax.random.uniform(bk, (1,), jnp.float32, -bound, bound)
    return dict(layers=layers, w_final=w_final, b_final=b_final)


def reference_forward(x, params):
    """Pure-JAX reference of the PyTorch forward (training-mode BatchNorm)."""
    h = x.astype(jnp.float32)
    for lyr in params["layers"]:
        h = h @ lyr["w"].T
        mu = jnp.mean(h, axis=0, keepdims=True)
        var = jnp.mean((h - mu) ** 2, axis=0, keepdims=True)
        h = (h - mu) / jnp.sqrt(var + BN_EPS) * lyr["bn_gamma"] + lyr["bn_beta"]
        lmu = jnp.mean(h, axis=-1, keepdims=True)
        lvar = jnp.mean((h - lmu) ** 2, axis=-1, keepdims=True)
        h = (h - lmu) / jnp.sqrt(lvar + LN_EPS) * lyr["ln_gamma"] + lyr["ln_beta"]
        h = jnp.where(h > 0, h, LEAK_VALUE * h)
    out = h @ params["w_final"].T + params["b_final"]
    return out.squeeze(-1)


if __name__ == "__main__":
    # Small cfg: latent_size=32, prop_pred_filters=(64, 32), batch=8
    B, LATENT = 8, 32
    FILTERS = (64, 32)

    key = jax.random.PRNGKey(0)
    key, xk = jax.random.split(key)
    x = jax.random.normal(xk, (B, LATENT), jnp.float32)
    params = init_params(key, LATENT, FILTERS)

    packed = pack_params(params, LATENT)          # one-time param prep (hoisted)

    y = property_predictor_forward(x, packed)
    y = jax.block_until_ready(y)

    y_ref = reference_forward(x, params)
    assert y.shape == (B,), y.shape
    assert jnp.allclose(y, y_ref, atol=1e-4, rtol=1e-4), (y, y_ref)

    print("KERNEL_OK")
</pallas_src>

<mosaic_0001>
module attributes {stable_mosaic.version = 11 : i64} {
  func.func @_predictor_kernel(%arg0: memref<8x32xf32, #tpu.memory_space<vmem>>, %arg1: memref<32x64xf32, #tpu.memory_space<vmem>>, %arg2: memref<64x32xf32, #tpu.memory_space<vmem>>, %arg3: memref<10x128xf32, #tpu.memory_space<vmem>>, %arg4: memref<8x1xf32, #tpu.memory_space<vmem>>) attributes {dimension_semantics = [], scalar_prefetch = 0 : i64, scratch_operands = 0 : i64, tpu.core_type = #tpu.core_type<tc>} {
    %c0 = arith.constant 0 : index
    %c0_0 = arith.constant 0 : index
    %0 = vector.load %arg0[%c0, %c0_0] : memref<8x32xf32, #tpu.memory_space<vmem>>, vector<8x32xf32>
    %c0_1 = arith.constant 0 : index
    %c0_2 = arith.constant 0 : index
    %1 = vector.load %arg1[%c0_1, %c0_2] : memref<32x64xf32, #tpu.memory_space<vmem>>, vector<32x64xf32>
    %cst = arith.constant dense<0.000000e+00> : vector<8x64xf32>
    %2 = tpu.matmul %0, %1, %cst {dimension_numbers = #tpu.dot_dimension_numbers<[1], [0], [0], [1], [0, 0, 1, 1], [], []>} : vector<8x32xf32>, vector<32x64xf32>, vector<8x64xf32> -> vector<8x64xf32>
    %c0_3 = arith.constant 0 : index
    %c0_4 = arith.constant 0 : index
    %3 = vector.load %arg3[%c0_3, %c0_4] : memref<10x128xf32, #tpu.memory_space<vmem>>, vector<1x64xf32>
    %c1 = arith.constant 1 : index
    %c0_5 = arith.constant 0 : index
    %4 = vector.load %arg3[%c1, %c0_5] : memref<10x128xf32, #tpu.memory_space<vmem>>, vector<1x64xf32>
    %c2 = arith.constant 2 : index
    %c0_6 = arith.constant 0 : index
    %5 = vector.load %arg3[%c2, %c0_6] : memref<10x128xf32, #tpu.memory_space<vmem>>, vector<1x64xf32>
    %c3 = arith.constant 3 : index
    %c0_7 = arith.constant 0 : index
    %6 = vector.load %arg3[%c3, %c0_7] : memref<10x128xf32, #tpu.memory_space<vmem>>, vector<1x64xf32>
    %cst_8 = arith.constant dense<0.000000e+00> : vector<64xf32>
    %7 = vector.multi_reduction <add>, %2, %cst_8 [0] : vector<8x64xf32> to vector<64xf32>
    %8 = vector.shape_cast %7 : vector<64xf32> to vector<1x64xf32>
    %cst_9 = arith.constant 1.250000e-01 : f32
    %9 = vector.broadcast %cst_9 : f32 to vector<1x64xf32>
    %10 = arith.mulf %8, %9 : vector<1x64xf32>
    %11 = arith.mulf %2, %2 : vector<8x64xf32>
    %cst_10 = arith.constant dense<0.000000e+00> : vector<64xf32>
    %12 = vector.multi_reduction <add>, %11, %cst_10 [0] : vector<8x64xf32> to vector<64xf32>
    %13 = vector.shape_cast %12 : vector<64xf32> to vector<1x64xf32>
    %cst_11 = arith.constant 1.250000e-01 : f32
    %14 = vector.broadcast %cst_11 : f32 to vector<1x64xf32>
    %15 = arith.mulf %13, %14 : vector<1x64xf32>
    %16 = arith.mulf %10, %10 : vector<1x64xf32>
    %17 = arith.subf %15, %16 : vector<1x64xf32>
    %cst_12 = arith.constant 9.99999974E-6 : f32
    %18 = vector.broadcast %cst_12 : f32 to vector<1x64xf32>
    %19 = arith.addf %17, %18 : vector<1x64xf32>
    %20 = math.rsqrt %19 : vector<1x64xf32>
    %21 = arith.mulf %3, %20 : vector<1x64xf32>
    %22 = arith.mulf %10, %21 : vector<1x64xf32>
    %23 = arith.subf %4, %22 : vector<1x64xf32>
    %24 = vector.broadcast %21 : vector<1x64xf32> to vector<8x64xf32>
    %25 = arith.mulf %2, %24 : vector<8x64xf32>
    %26 = vector.broadcast %23 : vector<1x64xf32> to vector<8x64xf32>
    %27 = arith.addf %25, %26 : vector<8x64xf32>
    %cst_13 = arith.constant dense<0.000000e+00> : vector<8xf32>
    %28 = vector.multi_reduction <add>, %27, %cst_13 [1] : vector<8x64xf32> to vector<8xf32>
    %29 = vector.shape_cast %28 : vector<8xf32> to vector<8x1xf32>
    %cst_14 = arith.constant 1.562500e-02 : f32
    %30 = vector.broadcast %cst_14 : f32 to vector<8x1xf32>
    %31 = arith.mulf %29, %30 : vector<8x1xf32>
    %32 = arith.mulf %27, %27 : vector<8x64xf32>
    %cst_15 = arith.constant dense<0.000000e+00> : vector<8xf32>
    %33 = vector.multi_reduction <add>, %32, %cst_15 [1] : vector<8x64xf32> to vector<8xf32>
    %34 = vector.shape_cast %33 : vector<8xf32> to vector<8x1xf32>
    %cst_16 = arith.constant 1.562500e-02 : f32
    %35 = vector.broadcast %cst_16 : f32 to vector<8x1xf32>
    %36 = arith.mulf %34, %35 : vector<8x1xf32>
    %37 = arith.mulf %31, %31 : vector<8x1xf32>
    %38 = arith.subf %36, %37 : vector<8x1xf32>
    %cst_17 = arith.constant 9.99999974E-6 : f32
    %39 = vector.broadcast %cst_17 : f32 to vector<8x1xf32>
    %40 = arith.addf %38, %39 : vector<8x1xf32>
    %41 = math.rsqrt %40 : vector<8x1xf32>
    %42 = vector.broadcast %31 : vector<8x1xf32> to vector<8x64xf32>
    %43 = arith.subf %27, %42 : vector<8x64xf32>
    %44 = vector.broadcast %41 : vector<8x1xf32> to vector<8x64xf32>
    %45 = arith.mulf %43, %44 : vector<8x64xf32>
    %46 = vector.broadcast %5 : vector<1x64xf32> to vector<8x64xf32>
    %47 = arith.mulf %45, %46 : vector<8x64xf32>
    %48 = vector.broadcast %6 : vector<1x64xf32> to vector<8x64xf32>
    %49 = arith.addf %47, %48 : vector<8x64xf32>
    %cst_18 = arith.constant 1.000000e-01 : f32
    %50 = vector.broadcast %cst_18 : f32 to vector<8x64xf32>
    %51 = arith.mulf %50, %49 : vector<8x64xf32>
    %52 = arith.maximumf %49, %51 : vector<8x64xf32>
    %c0_19 = arith.constant 0 : index
    %c0_20 = arith.constant 0 : index
    %53 = vector.load %arg2[%c0_19, %c0_20] : memref<64x32xf32, #tpu.memory_space<vmem>>, vector<64x32xf32>
    %cst_21 = arith.constant dense<0.000000e+00> : vector<8x32xf32>
    %54 = tpu.matmul %52, %53, %cst_21 {dimension_numbers = #tpu.dot_dimension_numbers<[1], [0], [0], [1], [0, 0, 1, 1], [], []>} : vector<8x64xf32>, vector<64x32xf32>, vector<8x32xf32> -> vector<8x32xf32>
    %c4 = arith.constant 4 : index
    %c0_22 = arith.constant 0 : index
    %55 = vector.load %arg3[%c4, %c0_22] : memref<10x128xf32, #tpu.memory_space<vmem>>, vector<1x32xf32>
    %c5 = arith.constant 5 : index
    %c0_23 = arith.constant 0 : index
    %56 = vector.load %arg3[%c5, %c0_23] : memref<10x128xf32, #tpu.memory_space<vmem>>, vector<1x32xf32>
    %c6 = arith.constant 6 : index
    %c0_24 = arith.constant 0 : index
    %57 = vector.load %arg3[%c6, %c0_24] : memref<10x128xf32, #tpu.memory_space<vmem>>, vector<1x32xf32>
    %c7 = arith.constant 7 : index
    %c0_25 = arith.constant 0 : index
    %58 = vector.load %arg3[%c7, %c0_25] : memref<10x128xf32, #tpu.memory_space<vmem>>, vector<1x32xf32>
    %cst_26 = arith.constant dense<0.000000e+00> : vector<32xf32>
    %59 = vector.multi_reduction <add>, %54, %cst_26 [0] : vector<8x32xf32> to vector<32xf32>
    %60 = vector.shape_cast %59 : vector<32xf32> to vector<1x32xf32>
    %cst_27 = arith.constant 1.250000e-01 : f32
    %61 = vector.broadcast %cst_27 : f32 to vector<1x32xf32>
    %62 = arith.mulf %60, %61 : vector<1x32xf32>
    %63 = arith.mulf %54, %54 : vector<8x32xf32>
    %cst_28 = arith.constant dense<0.000000e+00> : vector<32xf32>
    %64 = vector.multi_reduction <add>, %63, %cst_28 [0] : vector<8x32xf32> to vector<32xf32>
    %65 = vector.shape_cast %64 : vector<32xf32> to vector<1x32xf32>
    %cst_29 = arith.constant 1.250000e-01 : f32
    %66 = vector.broadcast %cst_29 : f32 to vector<1x32xf32>
    %67 = arith.mulf %65, %66 : vector<1x32xf32>
    %68 = arith.mulf %62, %62 : vector<1x32xf32>
    %69 = arith.subf %67, %68 : vector<1x32xf32>
    %cst_30 = arith.constant 9.99999974E-6 : f32
    %70 = vector.broadcast %cst_30 : f32 to vector<1x32xf32>
    %71 = arith.addf %69, %70 : vector<1x32xf32>
    %72 = math.rsqrt %71 : vector<1x32xf32>
    %73 = arith.mulf %55, %72 : vector<1x32xf32>
    %74 = arith.mulf %62, %73 : vector<1x32xf32>
    %75 = arith.subf %56, %74 : vector<1x32xf32>
    %76 = vector.broadcast %73 : vector<1x32xf32> to vector<8x32xf32>
    %77 = arith.mulf %54, %76 : vector<8x32xf32>
    %78 = vector.broadcast %75 : vector<1x32xf32> to vector<8x32xf32>
    %79 = arith.addf %77, %78 : vector<8x32xf32>
    %cst_31 = arith.constant dense<0.000000e+00> : vector<8xf32>
    %80 = vector.multi_reduction <add>, %79, %cst_31 [1] : vector<8x32xf32> to vector<8xf32>
    %81 = vector.shape_cast %80 : vector<8xf32> to vector<8x1xf32>
    %cst_32 = arith.constant 3.125000e-02 : f32
    %82 = vector.broadcast %cst_32 : f32 to vector<8x1xf32>
    %83 = arith.mulf %81, %82 : vector<8x1xf32>
    %84 = arith.mulf %79, %79 : vector<8x32xf32>
    %cst_33 = arith.constant dense<0.000000e+00> : vector<8xf32>
    %85 = vector.multi_reduction <add>, %84, %cst_33 [1] : vector<8x32xf32> to vector<8xf32>
    %86 = vector.shape_cast %85 : vector<8xf32> to vector<8x1xf32>
    %cst_34 = arith.constant 3.125000e-02 : f32
    %87 = vector.broadcast %cst_34 : f32 to vector<8x1xf32>
    %88 = arith.mulf %86, %87 : vector<8x1xf32>
    %89 = arith.mulf %83, %83 : vector<8x1xf32>
    %90 = arith.subf %88, %89 : vector<8x1xf32>
    %cst_35 = arith.constant 9.99999974E-6 : f32
    %91 = vector.broadcast %cst_35 : f32 to vector<8x1xf32>
    %92 = arith.addf %90, %91 : vector<8x1xf32>
    %93 = math.rsqrt %92 : vector<8x1xf32>
    %94 = vector.broadcast %83 : vector<8x1xf32> to vector<8x32xf32>
    %95 = arith.subf %79, %94 : vector<8x32xf32>
    %96 = vector.broadcast %93 : vector<8x1xf32> to vector<8x32xf32>
    %97 = arith.mulf %95, %96 : vector<8x32xf32>
    %98 = vector.broadcast %57 : vector<1x32xf32> to vector<8x32xf32>
    %99 = arith.mulf %97, %98 : vector<8x32xf32>
    %100 = vector.broadcast %58 : vector<1x32xf32> to vector<8x32xf32>
    %101 = arith.addf %99, %100 : vector<8x32xf32>
    %cst_36 = arith.constant 1.000000e-01 : f32
    %102 = vector.broadcast %cst_36 : f32 to vector<8x32xf32>
    %103 = arith.mulf %102, %101 : vector<8x32xf32>
    %104 = arith.maximumf %101, %103 : vector<8x32xf32>
    %c8 = arith.constant 8 : index
    %c0_37 = arith.constant 0 : index
    %105 = vector.load %arg3[%c8, %c0_37] : memref<10x128xf32, #tpu.memory_space<vmem>>, vector<1x32xf32>
    %c9 = arith.constant 9 : index
    %c0_38 = arith.constant 0 : index
    %106 = vector.load %arg3[%c9, %c0_38] : memref<10x128xf32, #tpu.memory_space<vmem>>, vector<1x1xf32>
    %107 = vector.broadcast %105 : vector<1x32xf32> to vector<8x32xf32>
    %108 = arith.mulf %104, %107 : vector<8x32xf32>
    %cst_39 = arith.constant dense<0.000000e+00> : vector<8xf32>
    %109 = vector.multi_reduction <add>, %108, %cst_39 [1] : vector<8x32xf32> to vector<8xf32>
    %110 = vector.shape_cast %109 : vector<8xf32> to vector<8x1xf32>
    %111 = vector.broadcast %106 : vector<1x1xf32> to vector<8x1xf32>
    %112 = arith.addf %110, %111 : vector<8x1xf32>
    %c0_40 = arith.constant 0 : index
    %c0_41 = arith.constant 0 : index
    %113 = vector.load %arg4[%c0_40, %c0_41] : memref<8x1xf32, #tpu.memory_space<vmem>>, vector<8x1xf32>
    tpu.vector_store %arg4[%c0_40, %c0_41], %112 {strides = array<i32>} : memref<8x1xf32, #tpu.memory_space<vmem>>, vector<8x1xf32>,
    return
  }
}

</mosaic_0001>

<bundles_post_ra>
// kernel: tpu_custom_call.1
= control target key start
LH: loop header
LB: loop body
LE: loop exit
PB: predicated region body
PF: predicated region fallthrough
CT: control target
= control target key end

     0   :  { %v410_v0 = vmov 0.0|0.0   ;;  %vm411_vm0 = vmmov 0   ;;  %v412_v4 = vmov 0.0   ;;  %vm22_vm1 = vcmask 261120   ;;  %s533_s1 = inlined_call_operand.vmem [shape: f32[32,64], index: 1, kind: input, shape index: {}]   ;;  %s534_s0 = inlined_call_operand.vmem [shape: f32[8,32], index: 0, kind: input, shape index: {}]   ;;  %s535_s3 = inlined_call_operand.vmem [shape: f32[10,128], index: 3, kind: input, shape index: {}]   ;;  %s536_s2 = inlined_call_operand.vmem [shape: f32[64,32], index: 2, kind: input, shape index: {}]   ;;  %s537_s4 = inlined_call_operand.vmem [shape: f32[8,1], index: 4, kind: output, shape index: {}]  }
   0x1   :  { %381 = vmatprep.subr.bf16.mxu0 %v410_v0  ;;  %v18_v1 = vld [vmem:[%s533_s1] sm:$0xff]  ;;  %v19_v2 = vld [vmem:[%s533_s1 + $0x8] sm:$0xff]  ;;  %v20_v3 = vld [vmem:[%s533_s1 + $0x10] sm:$0xff]  ;;  %359 = vmatprep.mubr.msk.f32.mxu0 %vm411_vm0, %v412_v4  ;;  %vm100_vm2 = vcmask 523264   ;;  %v125_v31 = vlaneseq  ;;  %vm323_vm3 = vcmask 7168  }
   0x2   :  { %v382_v5 = vpack.c.bf16 %v19_v2, %v18_v1  ;;  %v21_v6 = vld [vmem:[%s533_s1 + $0x18] sm:$0xff]  ;;  %387 = vmatprep.subr.bf16.mxu1 %v410_v0  ;;  %378 = vmatprep.mubr.msk.f32.mxu1 %vm411_vm0, %v412_v4  ;;  %v17_v8 = vld [vmem:[%s534_s0] sm:$0xff]  ;;  %v163_v48 = vld [vmem:[%s536_s2 + $0x8] sm:$0xff] }
   0x3   :  { %v385_v7 = vpack.c.bf16 %v21_v6, %v20_v3  ;;  %v126_v32 = vshrl.u32 %v125_v31, 7  ;;  %v96_v33 = vld [vmem:[%s535_s3] sm:$0x1]  ;;  %v97_v37 = vld [vmem:[%s535_s3 + $0x1] sm:$0x1]  ;;  %v164_v49 = vld [vmem:[%s536_s2 + $0x10] sm:$0xff] }
   0x4   :  { %383 = vmatpush3.bf16.msra.mxu0 %v382_v5  ;;  %v162_v47 = vld [vmem:[%s536_s2] sm:$0xff]  ;;  %v165_v51 = vld [vmem:[%s536_s2 + $0x18] sm:$0xff]  ;;  %v167_v54 = vld [vmem:[%s536_s2 + $0x28] sm:$0xff] }
   0x5   :  { %384 = vmatprep.subr.bf16.mxu0 %v410_v0  ;;  %v462_v34 = vsub.s32 0, %v126_v32  ;;  %v388_v50 = vpack.c.bf16 %v163_v48, %v162_v47  ;;  %v391_v52 = vpack.c.bf16 %v165_v51, %v164_v49  ;;  %v166_v53 = vld [vmem:[%s536_s2 + $0x20] sm:$0xff]  ;;  %v168_v56 = vld [vmem:[%s536_s2 + $0x30] sm:$0xff]  ;;  %v169_v57 = vld [vmem:[%s536_s2 + $0x38] sm:$0xff] }
   0x6   :  { %v394_v55 = vpack.c.bf16 %v167_v54, %v166_v53  ;;  %v397_v58 = vpack.c.bf16 %v169_v57, %v168_v56  ;;  %v330_v5 = vld [vmem:[%s535_s3 + $0x2] ss:$0 sm:$0xff]  ;;  %v334_v57 = vld [vmem:[%s535_s3 + $0x7] ss:$0 sm:$0xff] }
   0x7   :  { %389 = vmatpush3.bf16.msra.mxu1 %v388_v50 }
   0x8   :  { %386 = vmatpush3.bf16.msra.mxu0 %v385_v7  ;;  %390 = vmatprep.subr.bf16.mxu1 %v410_v0 }
   0xb   :  { %360 = vmatmul.mubr.msk.f32.vlgmr.msra.gmra.mrb[0].mxu0 %vm22_vm1, %v17_v8  ;;  %392 = vmatpush3.bf16.msra.mxu1 %v391_v52 }
   0xc   :  { %393 = vmatprep.subr.bf16.mxu1 %v410_v0 }
   0xf   :  { %395 = vmatpush3.bf16.msra.mxu1 %v394_v55 }
  0x10   :  { %396 = vmatprep.subr.bf16.mxu1 %v410_v0  ;;  %v331_v0 = vld [vmem:[%s535_s3 + $0x3] ss:$0 sm:$0xff] }
  0x13   :  { %398 = vmatpush3.bf16.msra.mxu1 %v397_v58 }
  0xde   :  { %v92_v9 = vpop.f32.mrb[0].mxu0 }
  0xdf   :  { %v101_v10 = vsel %vm100_vm2, %v92_v9, 0.0  ;;  %v109_v11 = vmul.f32 %v92_v9, %v92_v9  ;;  %v361_v12 = vpop.f32.mrb[1].mxu0 }
  0xe0   :  { %v102_v13 = vrot.slane %v101_v10, 4 }
  0xe1   :  { %v110_v14 = vsel %vm100_vm2, %v109_v11, 0.0 }
  0xe2   :  { %v103_v15 = vadd.f32 %v102_v13, %v101_v10  ;;  %v111_v16 = vrot.slane %v110_v14, 4 }
  0xe4   :  { %v104_v17 = vrot.slane %v103_v15, 2  ;;  %v112_v18 = vadd.f32 %v111_v16, %v110_v14 }
  0xe6   :  { %v105_v19 = vadd.f32 %v104_v17, %v103_v15  ;;  %v113_v20 = vrot.slane %v112_v18, 2 }
  0xe8   :  { %v106_v21 = vrot.slane %v105_v19, 1  ;;  %v114_v22 = vadd.f32 %v113_v20, %v112_v18 }
  0xea   :  { %v107_v23 = vadd.f32 %v106_v21, %v105_v19  ;;  %v115_v24 = vrot.slane %v114_v22, 1 }
  0xec   :  { %v108_v25 = vmul.f32 0.125, %v107_v23  ;;  %v116_v26 = vadd.f32 %v115_v24, %v114_v22 }
  0xee   :  { %v117_v27 = vmul.f32 0.125, %v116_v26  ;;  %v118_v28 = vmul.f32 %v108_v25, %v108_v25 }
  0xf0   :  { %v119_v29 = vsub.f32 %v117_v27, %v118_v28 }
  0xf2   :  { %v120_v30 = vadd.f32 1e-05, %v119_v29 }
  0xf4   :  { %402 = vrsqrt.f32 %v120_v30 }
  0xfe   :  { %v403_v35 = vpop.eup %402 }
  0xff   :  { %v122_v36 = vmul.f32 %v403_v35, %v96_v33  ;;  %v243_v33 = vld [vmem:[%s535_s3 + $0x4] sm:$0x1] }
 0x101   :  { %v123_v38 = vmul.f32 %v122_v36, %v108_v25  ;;  %v128_v39 = vrot.slane %v122_v36, %v462_v34 }
 0x103   :  { %v124_v40 = vsub.f32 %v97_v37, %v123_v38  ;;  %v129_v41 = vmul.f32 %v128_v39, %v92_v9  ;;  %v244_v37 = vld [vmem:[%s535_s3 + $0x5] sm:$0x1] }
 0x105   :  { %v133_v42 = vrot.slane %v124_v40, %v462_v34 }
 0x107   :  { %v134_v43 = vadd.f32 %v133_v42, %v129_v41 }
 0x109   :  { %v135_v44 = vsel %vm100_vm2, %v134_v43, 0.0  ;;  %v139_v45 = vmul.f32 %v134_v43, %v134_v43 }
 0x10a   :  { %136 = vadd.xlane.f32.xlu0 %v135_v44 }
 0x10b   :  { %v140_v46 = vsel %vm100_vm2, %v139_v45, 0.0 }
 0x10e   :  { %141 = vadd.xlane.f32.xlu0 %v140_v46 }
 0x197   :  { %v137_v59 = vpop.xlane.xlu0 %136 }
 0x198   :  { %v138_v60 = vmul.f32 0.015625, %v137_v59 }
 0x19a   :  { %v144_v62 = vmul.f32 %v138_v60, %v138_v60  ;;  %v148_v3 = vsub.f32 %v134_v43, %v138_v60 }
 0x19b   :  { %v142_v61 = vpop.xlane.xlu0 %141 }
 0x19c   :  { %v143_v63 = vmul.f32 0.015625, %v142_v61  ;;  %v335_v61 = vld [vmem:[%s535_s3 + $0x8] ss:$0 sm:$0xff] }
 0x19e   :  { %v145_v1 = vsub.f32 %v143_v63, %v144_v62 }
 0x1a0   :  { %v146_v2 = vadd.f32 1e-05, %v145_v1 }
 0x1a2   :  { %404 = vrsqrt.f32 %v146_v2  ;;  %v336_v2 = vld [vmem:[%s535_s3 + $0x9] ss:$0 sm:$0xff] }
 0x1ac   :  { %v405_v4 = vpop.eup %404 }
 0x1ad   :  { %v149_v6 = vmul.f32 %v405_v4, %v148_v3 }
 0x1af   :  { %v154_v7 = vmul.f32 %v330_v5, %v149_v6 }
 0x1b1   :  { %v159_v8 = vadd.f32 %v331_v0, %v154_v7 }
 0x1b3   :  { %v160_v9 = vmul.f32 0.1, %v159_v8 }
 0x1b5   :  { %v161_v10 = vmax.f32 %v159_v8, %v160_v9 }
 0x1b7   :  { %379 = vmatmul.mubr.msk.f32.vlgmr.msra.gmra.mrb[0].mxu1 %vm100_vm2, %v161_v10 }
 0x28a   :  { %v239_v11 = vpop.f32.mrb[0].mxu1 }
 0x28b   :  { %v247_v12 = vsel %vm22_vm1, %v239_v11, 0.0  ;;  %v255_v13 = vmul.f32 %v239_v11, %v239_v11  ;;  %v380_v14 = vpop.f32.mrb[1].mxu1 }
 0x28c   :  { %v248_v15 = vrot.slane %v247_v12, 4 }
 0x28d   :  { %v256_v16 = vsel %vm22_vm1, %v255_v13, 0.0 }
 0x28e   :  { %v249_v17 = vadd.f32 %v248_v15, %v247_v12  ;;  %v257_v18 = vrot.slane %v256_v16, 4 }
 0x290   :  { %v250_v19 = vrot.slane %v249_v17, 2  ;;  %v258_v20 = vadd.f32 %v257_v18, %v256_v16 }
 0x292   :  { %v251_v21 = vadd.f32 %v250_v19, %v249_v17  ;;  %v259_v22 = vrot.slane %v258_v20, 2 }
 0x294   :  { %v252_v23 = vrot.slane %v251_v21, 1  ;;  %v260_v24 = vadd.f32 %v259_v22, %v258_v20 }
 0x296   :  { %v253_v25 = vadd.f32 %v252_v23, %v251_v21  ;;  %v261_v26 = vrot.slane %v260_v24, 1 }
 0x298   :  { %v254_v27 = vmul.f32 0.125, %v253_v25  ;;  %v262_v28 = vadd.f32 %v261_v26, %v260_v24 }
 0x29a   :  { %v263_v29 = vmul.f32 0.125, %v262_v28  ;;  %v264_v30 = vmul.f32 %v254_v27, %v254_v27 }
 0x29c   :  { %v265_v31 = vsub.f32 %v263_v29, %v264_v30 }
 0x29e   :  { %v266_v32 = vadd.f32 1e-05, %v265_v31 }
 0x2a0   :  { %406 = vrsqrt.f32 %v266_v32 }
 0x2aa   :  { %v407_v35 = vpop.eup %406 }
 0x2ab   :  { %v268_v36 = vmul.f32 %v407_v35, %v243_v33 }
 0x2ad   :  { %v269_v38 = vmul.f32 %v268_v36, %v254_v27  ;;  %v274_v39 = vrot.slane %v268_v36, %v462_v34 }
 0x2af   :  { %v270_v40 = vsub.f32 %v244_v37, %v269_v38  ;;  %v275_v41 = vmul.f32 %v274_v39, %v239_v11 }
 0x2b1   :  { %v279_v42 = vrot.slane %v270_v40, %v462_v34  ;;  %v333_v34 = vld [vmem:[%s535_s3 + $0x6] ss:$0 sm:$0xff] }
 0x2b3   :  { %v280_v43 = vadd.f32 %v279_v42, %v275_v41 }
 0x2b5   :  { %v281_v44 = vsel %vm22_vm1, %v280_v43, 0.0  ;;  %v285_v45 = vmul.f32 %v280_v43, %v280_v43 }
 0x2b6   :  { %282 = vadd.xlane.f32.xlu1 %v281_v44 }
 0x2b7   :  { %v286_v46 = vsel %vm22_vm1, %v285_v45, 0.0 }
 0x2ba   :  { %287 = vadd.xlane.f32.xlu1 %v286_v46 }
 0x343   :  { %v283_v47 = vpop.xlane.xlu1 %282 }
 0x344   :  { %v284_v48 = vmul.f32 0.03125, %v283_v47 }
 0x346   :  { %v290_v50 = vmul.f32 %v284_v48, %v284_v48  ;;  %v294_v54 = vsub.f32 %v280_v43, %v284_v48 }
 0x347   :  { %v288_v49 = vpop.xlane.xlu1 %287 }
 0x348   :  { %v289_v51 = vmul.f32 0.03125, %v288_v49 }
 0x34a   :  { %v291_v52 = vsub.f32 %v289_v51, %v290_v50 }
 0x34c   :  { %v292_v53 = vadd.f32 1e-05, %v291_v52 }
 0x34e   :  { %408 = vrsqrt.f32 %v292_v53 }
 0x358   :  { %v409_v55 = vpop.eup %408 }
 0x359   :  { %v295_v56 = vmul.f32 %v409_v55, %v294_v54 }
 0x35b   :  { %v300_v58 = vmul.f32 %v333_v34, %v295_v56 }
 0x35d   :  { %v305_v59 = vadd.f32 %v334_v57, %v300_v58 }
 0x35f   :  { %v306_v60 = vmul.f32 0.1, %v305_v59 }
 0x361   :  { %v307_v62 = vmax.f32 %v305_v59, %v306_v60 }
 0x363   :  { %v314_v63 = vmul.f32 %v335_v61, %v307_v62 }
 0x365   :  { %v315_v1 = vsel %vm22_vm1, %v314_v63, 0.0 }
 0x366   :  { %316 = vadd.xlane.f32.xlu0 %v315_v1 }
 0x3f3   :  { %v317_v3 = vpop.xlane.xlu0 %316 }
 0x3f4   :  { %v322_v4 = vadd.f32 %v336_v2, %v317_v3 }
 0x3f6   :  { %324 = vst.msk [vmem:[%s537_s4] sm:$0xff] %vm323_vm3, %v322_v4 }

</bundles_post_ra>
